<compile_context>
chip_gen: v7x
topology: tpu7x:2x2x1
jax: 0.10.0
libtpu: 0.0.40
codegen_flags: <defaults>
</compile_context>

<pallas_src>
import functools
import math

import jax
import jax.numpy as jnp
from jax import lax
from jax.experimental import pallas as pl
from jax.experimental.pallas import tpu as pltpu


# ----------------------------------------------------------------------------
# Shared per-head attention core (operates on VMEM-resident values).
# q_all: (Sq, D), k_all/v_all: (Sk, D)  ->  (Sq, D)
# ----------------------------------------------------------------------------
def _attention_heads(q_all, k_all, v_all, h, d_k, scale):
    head_outs = []
    for hh in range(h):                       # static unrolled loop over heads
        lo = hh * d_k
        # Fold 1/sqrt(d_k) into q (Sq*d_k multiplies instead of Sq*Sk).
        q = q_all[:, lo:lo + d_k] * scale
        k = k_all[:, lo:lo + d_k]
        v = v_all[:, lo:lo + d_k]

        # Q @ K^T without materializing the transpose: contract last dims.
        s = lax.dot_general(
            q, k,
            dimension_numbers=(((1,), (1,)), ((), ())),
            preferred_element_type=jnp.float32,
        )                                      # (Sq, Sk)

        # Numerically-stable softmax; reciprocal runs on the EUP slot.
        m = jnp.max(s, axis=-1, keepdims=True)
        e = jnp.exp(s - m)
        denom = jnp.sum(e, axis=-1, keepdims=True)
        p = e * pl.reciprocal(denom, approx=True)

        head_outs.append(
            jnp.dot(p, v, preferred_element_type=jnp.float32)    # (Sq, d_k)
        )

    # Pack all heads into one lane-dense (Sq, D) value.
    return jnp.concatenate(head_outs, axis=-1)


# ----------------------------------------------------------------------------
# Fully fused SELF-attention kernel: x -> QKV proj -> attention -> out proj.
# One batch per grid step; weights stay VMEM-resident across the grid.
# ----------------------------------------------------------------------------
def _self_mha_kernel(x_ref, wqkv_ref, bqkv_ref, wo_ref, bo_ref, o_ref,
                     *, h, d_k, scale):
    D = h * d_k
    x = x_ref[0].astype(jnp.float32)                           # (S, D)

    # Fused Q|K|V projection: one (S,D) @ (D,3D) MXU matmul.
    qkv = jnp.dot(x, wqkv_ref[...].astype(jnp.float32),
                  preferred_element_type=jnp.float32)
    qkv = qkv + bqkv_ref[...].astype(jnp.float32)              # (S, 3D)

    attn = _attention_heads(qkv[:, :D], qkv[:, D:2 * D], qkv[:, 2 * D:],
                            h, d_k, scale)                     # (S, D)

    # Output projection fused in-kernel (no HBM round trip of attn output).
    out = jnp.dot(attn, wo_ref[...].astype(jnp.float32),
                  preferred_element_type=jnp.float32)
    out = out + bo_ref[...].astype(jnp.float32)
    o_ref[0] = out.astype(o_ref.dtype)


def pallas_self_mha(x, w_qkv, b_qkv, w_o, b_o, h, d_k):
    """x: [B, S, D]; w_qkv: [D, 3D]; w_o: [D, D] -> [B, S, D]."""
    B, S, D = x.shape
    kernel = functools.partial(_self_mha_kernel, h=h, d_k=d_k,
                               scale=1.0 / math.sqrt(d_k))
    return pl.pallas_call(
        kernel,
        out_shape=jax.ShapeDtypeStruct((B, S, D), x.dtype),
        grid=(B,),
        in_specs=[
            pl.BlockSpec((1, S, D), lambda b: (b, 0, 0)),
            pl.BlockSpec((D, 3 * D), lambda b: (0, 0)),      # constant index ->
            pl.BlockSpec((1, 3 * D), lambda b: (0, 0)),      # weights stay resident
            pl.BlockSpec((D, D), lambda b: (0, 0)),
            pl.BlockSpec((1, D), lambda b: (0, 0)),
        ],
        out_specs=pl.BlockSpec((1, S, D), lambda b: (b, 0, 0)),
        compiler_params=pltpu.CompilerParams(
            dimension_semantics=("parallel",),               # megacore over batch
        ),
    )(x, w_qkv, b_qkv.reshape(1, 3 * D), w_o, b_o.reshape(1, D))


# ----------------------------------------------------------------------------
# Fully fused CROSS-attention kernel (query/key/value distinct tensors).
# ----------------------------------------------------------------------------
def _cross_mha_kernel(q_ref, k_ref, v_ref,
                      wq_ref, bq_ref, wk_ref, bk_ref, wv_ref, bv_ref,
                      wo_ref, bo_ref, o_ref, *, h, d_k, scale):
    q_all = jnp.dot(q_ref[0].astype(jnp.float32), wq_ref[...],
                    preferred_element_type=jnp.float32) + bq_ref[...]
    k_all = jnp.dot(k_ref[0].astype(jnp.float32), wk_ref[...],
                    preferred_element_type=jnp.float32) + bk_ref[...]
    v_all = jnp.dot(v_ref[0].astype(jnp.float32), wv_ref[...],
                    preferred_element_type=jnp.float32) + bv_ref[...]

    attn = _attention_heads(q_all, k_all, v_all, h, d_k, scale)  # (Sq, D)

    out = jnp.dot(attn, wo_ref[...],
                  preferred_element_type=jnp.float32) + bo_ref[...]
    o_ref[0] = out.astype(o_ref.dtype)


def pallas_cross_mha(query, key, value, qkv_params, w_o, b_o, h, d_k):
    """query: [B, Sq, D]; key/value: [B, Sk, D] -> [B, Sq, D]."""
    B, Sq, D = query.shape
    _, Sk, _ = key.shape
    (wq, bq), (wk, bk), (wv, bv) = qkv_params
    kernel = functools.partial(_cross_mha_kernel, h=h, d_k=d_k,
                               scale=1.0 / math.sqrt(d_k))
    wspec = pl.BlockSpec((D, D), lambda b: (0, 0))
    bspec = pl.BlockSpec((1, D), lambda b: (0, 0))
    return pl.pallas_call(
        kernel,
        out_shape=jax.ShapeDtypeStruct((B, Sq, D), query.dtype),
        grid=(B,),
        in_specs=[
            pl.BlockSpec((1, Sq, D), lambda b: (b, 0, 0)),
            pl.BlockSpec((1, Sk, D), lambda b: (b, 0, 0)),
            pl.BlockSpec((1, Sk, D), lambda b: (b, 0, 0)),
            wspec, bspec, wspec, bspec, wspec, bspec, wspec, bspec,
        ],
        out_specs=pl.BlockSpec((1, Sq, D), lambda b: (b, 0, 0)),
        compiler_params=pltpu.CompilerParams(
            dimension_semantics=("parallel",),
        ),
    )(query, key, value,
      wq, bq.reshape(1, D), wk, bk.reshape(1, D), wv, bv.reshape(1, D),
      w_o, b_o.reshape(1, D))


# ----------------------------------------------------------------------------
# MultiHeadedAttention wrapper (parameters live in plain JAX)
# ----------------------------------------------------------------------------
class MultiHeadedAttentionPallas:
    def __init__(self, h, d_model, key):
        assert d_model % h == 0
        self.h = h
        self.d_k = d_model // h
        self.d_model = d_model

        # Deterministic synthetic init mimicking nn.Linear's U(-1/sqrt(fan_in), .)
        bound = 1.0 / math.sqrt(d_model)
        keys = jax.random.split(key, 8)
        ws, bs = [], []
        for i in range(4):
            ws.append(jax.random.uniform(
                keys[2 * i], (d_model, d_model), jnp.float32, -bound, bound))
            bs.append(jax.random.uniform(
                keys[2 * i + 1], (d_model,), jnp.float32, -bound, bound))

        # Individual projections (reference + cross-attention path).
        self.params = list(zip(ws, bs))
        # Fused QKV projection (self-attention fast path): one [D, 3D] matmul.
        self.w_qkv = jnp.concatenate(ws[:3], axis=1)
        self.b_qkv = jnp.concatenate(bs[:3], axis=0)
        self.w_o, self.b_o = ws[3], bs[3]

    def __call__(self, query, key, value):
        if (query is key) and (key is value):
            # Self-attention: fully fused kernel with one [D, 3D] projection.
            return pallas_self_mha(query, self.w_qkv, self.b_qkv,
                                   self.w_o, self.b_o, self.h, self.d_k)
        # Cross-attention: fully fused kernel with three separate projections.
        return pallas_cross_mha(query, key, value, self.params[:3],
                                self.w_o, self.b_o, self.h, self.d_k)


# ----------------------------------------------------------------------------
# Pure-JAX reference (for correctness sanity check)
# ----------------------------------------------------------------------------
def reference_forward(mha, query, key, value):
    B, Sq, D = query.shape

    def proj(x, wb):
        w, b = wb
        S = x.shape[1]
        y = x.reshape(B * S, D) @ w + b
        return y.reshape(B, S, mha.h, mha.d_k).transpose(0, 2, 1, 3)

    q = proj(query, mha.params[0])
    k = proj(key, mha.params[1])
    v = proj(value, mha.params[2])
    scores = jnp.einsum("bhqd,bhkd->bhqk", q, k) / math.sqrt(mha.d_k)
    p = jax.nn.softmax(scores, axis=-1)
    x = jnp.einsum("bhqk,bhkd->bhqd", p, v)
    x = x.transpose(0, 2, 1, 3).reshape(B, Sq, D)
    w_o, b_o = mha.params[3]
    return (x.reshape(B * Sq, D) @ w_o + b_o).reshape(B, Sq, D)


if __name__ == "__main__":
    B, S, d_model, h = 2, 8, 32, 4

    root = jax.random.PRNGKey(0)
    k_param, k_x, k_k, k_v = jax.random.split(root, 4)
    mha = MultiHeadedAttentionPallas(h, d_model, k_param)

    # Self-attention (fused-QKV fast path).
    x_in = jax.random.normal(k_x, (B, S, d_model), jnp.float32)
    out_self = jax.block_until_ready(mha(x_in, x_in, x_in))
    ref_self = reference_forward(mha, x_in, x_in, x_in)
    assert out_self.shape == (B, S, d_model)
    # Tolerance loosened slightly for the approx EUP reciprocal in softmax.
    assert jnp.allclose(out_self, ref_self, atol=2e-3, rtol=2e-3)

    # Cross-attention (separate projection path).
    k_in = jax.random.normal(k_k, (B, S, d_model), jnp.float32)
    v_in = jax.random.normal(k_v, (B, S, d_model), jnp.float32)
    out_cross = jax.block_until_ready(mha(x_in, k_in, v_in))
    ref_cross = reference_forward(mha, x_in, k_in, v_in)
    assert jnp.allclose(out_cross, ref_cross, atol=2e-3, rtol=2e-3)

    print("KERNEL_OK")
</pallas_src>

<mosaic_0001>
module attributes {stable_mosaic.version = 11 : i64} {
  func.func @_self_mha_kernel(%arg0: i32, %arg1: memref<1x8x32xf32, #tpu.memory_space<vmem>>, %arg2: memref<32x96xf32, #tpu.memory_space<vmem>>, %arg3: memref<1x96xf32, #tpu.memory_space<vmem>>, %arg4: memref<32x32xf32, #tpu.memory_space<vmem>>, %arg5: memref<1x32xf32, #tpu.memory_space<vmem>>, %arg6: memref<1x8x32xf32, #tpu.memory_space<vmem>>) attributes {dimension_semantics = [#tpu.dimension_semantics<parallel>], iteration_bounds = array<i64: 2>, scalar_prefetch = 0 : i64, scratch_operands = 0 : i64, tpu.core_type = #tpu.core_type<tc>, window_params = [{transform_indices = @transform_0, window_bounds = array<i64: 1, 8, 32>}, {pipeline_mode = #tpu.pipeline_mode<synchronous>, transform_indices = @transform_1, window_bounds = array<i64: 32, 96>}, {pipeline_mode = #tpu.pipeline_mode<synchronous>, transform_indices = @transform_2, window_bounds = array<i64: 1, 96>}, {pipeline_mode = #tpu.pipeline_mode<synchronous>, transform_indices = @transform_3, window_bounds = array<i64: 32, 32>}, {pipeline_mode = #tpu.pipeline_mode<synchronous>, transform_indices = @transform_4, window_bounds = array<i64: 1, 32>}, {transform_indices = @transform_5, window_bounds = array<i64: 1, 8, 32>}]} {
    %c0 = arith.constant 0 : index
    %c0_0 = arith.constant 0 : index
    %c0_1 = arith.constant 0 : index
    %0 = vector.load %arg1[%c0, %c0_0, %c0_1] : memref<1x8x32xf32, #tpu.memory_space<vmem>>, vector<1x8x32xf32>
    %1 = vector.shape_cast %0 : vector<1x8x32xf32> to vector<8x32xf32>
    %c0_2 = arith.constant 0 : index
    %c0_3 = arith.constant 0 : index
    %2 = vector.load %arg2[%c0_2, %c0_3] : memref<32x96xf32, #tpu.memory_space<vmem>>, vector<32x96xf32>
    %cst = arith.constant dense<0.000000e+00> : vector<8x96xf32>
    %3 = tpu.matmul %1, %2, %cst {dimension_numbers = #tpu.dot_dimension_numbers<[1], [0], [0], [1], [0, 0, 1, 1], [], []>} : vector<8x32xf32>, vector<32x96xf32>, vector<8x96xf32> -> vector<8x96xf32>
    %c0_4 = arith.constant 0 : index
    %c0_5 = arith.constant 0 : index
    %4 = vector.load %arg3[%c0_4, %c0_5] : memref<1x96xf32, #tpu.memory_space<vmem>>, vector<1x96xf32>
    %5 = vector.broadcast %4 : vector<1x96xf32> to vector<8x96xf32>
    %6 = arith.addf %3, %5 : vector<8x96xf32>
    %7 = vector.extract_strided_slice %6 {offsets = [0, 0], sizes = [8, 32], strides = [1, 1]} : vector<8x96xf32> to vector<8x32xf32>
    %8 = vector.extract_strided_slice %6 {offsets = [0, 32], sizes = [8, 32], strides = [1, 1]} : vector<8x96xf32> to vector<8x32xf32>
    %9 = vector.extract_strided_slice %6 {offsets = [0, 64], sizes = [8, 32], strides = [1, 1]} : vector<8x96xf32> to vector<8x32xf32>
    %10 = vector.extract_strided_slice %7 {offsets = [0, 0], sizes = [8, 8], strides = [1, 1]} : vector<8x32xf32> to vector<8x8xf32>
    %cst_6 = arith.constant 0.353553385 : f32
    %11 = vector.broadcast %cst_6 : f32 to vector<8x8xf32>
    %12 = arith.mulf %10, %11 : vector<8x8xf32>
    %13 = vector.extract_strided_slice %8 {offsets = [0, 0], sizes = [8, 8], strides = [1, 1]} : vector<8x32xf32> to vector<8x8xf32>
    %14 = vector.extract_strided_slice %9 {offsets = [0, 0], sizes = [8, 8], strides = [1, 1]} : vector<8x32xf32> to vector<8x8xf32>
    %cst_7 = arith.constant dense<0.000000e+00> : vector<8x8xf32>
    %15 = tpu.matmul %12, %13, %cst_7 {dimension_numbers = #tpu.dot_dimension_numbers<[1], [1], [0], [0], [0, 0, 1, 0], [], []>} : vector<8x8xf32>, vector<8x8xf32>, vector<8x8xf32> -> vector<8x8xf32>
    %cst_8 = arith.constant dense<0xFF800000> : vector<8xf32>
    %16 = vector.multi_reduction <maximumf>, %15, %cst_8 [1] : vector<8x8xf32> to vector<8xf32>
    %17 = vector.shape_cast %16 : vector<8xf32> to vector<8x1xf32>
    %18 = vector.broadcast %17 : vector<8x1xf32> to vector<8x8xf32>
    %19 = arith.subf %15, %18 : vector<8x8xf32>
    %20 = math.exp %19 : vector<8x8xf32>
    %cst_9 = arith.constant dense<0.000000e+00> : vector<8xf32>
    %21 = vector.multi_reduction <add>, %20, %cst_9 [1] : vector<8x8xf32> to vector<8xf32>
    %22 = vector.shape_cast %21 : vector<8xf32> to vector<8x1xf32>
    %23 = tpu.reciprocal %22 {approx = true} : vector<8x1xf32> -> vector<8x1xf32>
    %24 = vector.broadcast %23 : vector<8x1xf32> to vector<8x8xf32>
    %25 = arith.mulf %20, %24 : vector<8x8xf32>
    %cst_10 = arith.constant dense<0.000000e+00> : vector<8x8xf32>
    %26 = tpu.matmul %25, %14, %cst_10 {dimension_numbers = #tpu.dot_dimension_numbers<[1], [0], [0], [1], [0, 0, 1, 1], [], []>} : vector<8x8xf32>, vector<8x8xf32>, vector<8x8xf32> -> vector<8x8xf32>
    %27 = vector.extract_strided_slice %7 {offsets = [0, 8], sizes = [8, 8], strides = [1, 1]} : vector<8x32xf32> to vector<8x8xf32>
    %cst_11 = arith.constant 0.353553385 : f32
    %28 = vector.broadcast %cst_11 : f32 to vector<8x8xf32>
    %29 = arith.mulf %27, %28 : vector<8x8xf32>
    %30 = vector.extract_strided_slice %8 {offsets = [0, 8], sizes = [8, 8], strides = [1, 1]} : vector<8x32xf32> to vector<8x8xf32>
    %31 = vector.extract_strided_slice %9 {offsets = [0, 8], sizes = [8, 8], strides = [1, 1]} : vector<8x32xf32> to vector<8x8xf32>
    %cst_12 = arith.constant dense<0.000000e+00> : vector<8x8xf32>
    %32 = tpu.matmul %29, %30, %cst_12 {dimension_numbers = #tpu.dot_dimension_numbers<[1], [1], [0], [0], [0, 0, 1, 0], [], []>} : vector<8x8xf32>, vector<8x8xf32>, vector<8x8xf32> -> vector<8x8xf32>
    %cst_13 = arith.constant dense<0xFF800000> : vector<8xf32>
    %33 = vector.multi_reduction <maximumf>, %32, %cst_13 [1] : vector<8x8xf32> to vector<8xf32>
    %34 = vector.shape_cast %33 : vector<8xf32> to vector<8x1xf32>
    %35 = vector.broadcast %34 : vector<8x1xf32> to vector<8x8xf32>
    %36 = arith.subf %32, %35 : vector<8x8xf32>
    %37 = math.exp %36 : vector<8x8xf32>
    %cst_14 = arith.constant dense<0.000000e+00> : vector<8xf32>
    %38 = vector.multi_reduction <add>, %37, %cst_14 [1] : vector<8x8xf32> to vector<8xf32>
    %39 = vector.shape_cast %38 : vector<8xf32> to vector<8x1xf32>
    %40 = tpu.reciprocal %39 {approx = true} : vector<8x1xf32> -> vector<8x1xf32>
    %41 = vector.broadcast %40 : vector<8x1xf32> to vector<8x8xf32>
    %42 = arith.mulf %37, %41 : vector<8x8xf32>
    %cst_15 = arith.constant dense<0.000000e+00> : vector<8x8xf32>
    %43 = tpu.matmul %42, %31, %cst_15 {dimension_numbers = #tpu.dot_dimension_numbers<[1], [0], [0], [1], [0, 0, 1, 1], [], []>} : vector<8x8xf32>, vector<8x8xf32>, vector<8x8xf32> -> vector<8x8xf32>
    %44 = vector.extract_strided_slice %7 {offsets = [0, 16], sizes = [8, 8], strides = [1, 1]} : vector<8x32xf32> to vector<8x8xf32>
    %cst_16 = arith.constant 0.353553385 : f32
    %45 = vector.broadcast %cst_16 : f32 to vector<8x8xf32>
    %46 = arith.mulf %44, %45 : vector<8x8xf32>
    %47 = vector.extract_strided_slice %8 {offsets = [0, 16], sizes = [8, 8], strides = [1, 1]} : vector<8x32xf32> to vector<8x8xf32>
    %48 = vector.extract_strided_slice %9 {offsets = [0, 16], sizes = [8, 8], strides = [1, 1]} : vector<8x32xf32> to vector<8x8xf32>
    %cst_17 = arith.constant dense<0.000000e+00> : vector<8x8xf32>
    %49 = tpu.matmul %46, %47, %cst_17 {dimension_numbers = #tpu.dot_dimension_numbers<[1], [1], [0], [0], [0, 0, 1, 0], [], []>} : vector<8x8xf32>, vector<8x8xf32>, vector<8x8xf32> -> vector<8x8xf32>
    %cst_18 = arith.constant dense<0xFF800000> : vector<8xf32>
    %50 = vector.multi_reduction <maximumf>, %49, %cst_18 [1] : vector<8x8xf32> to vector<8xf32>
    %51 = vector.shape_cast %50 : vector<8xf32> to vector<8x1xf32>
    %52 = vector.broadcast %51 : vector<8x1xf32> to vector<8x8xf32>
    %53 = arith.subf %49, %52 : vector<8x8xf32>
    %54 = math.exp %53 : vector<8x8xf32>
    %cst_19 = arith.constant dense<0.000000e+00> : vector<8xf32>
    %55 = vector.multi_reduction <add>, %54, %cst_19 [1] : vector<8x8xf32> to vector<8xf32>
    %56 = vector.shape_cast %55 : vector<8xf32> to vector<8x1xf32>
    %57 = tpu.reciprocal %56 {approx = true} : vector<8x1xf32> -> vector<8x1xf32>
    %58 = vector.broadcast %57 : vector<8x1xf32> to vector<8x8xf32>
    %59 = arith.mulf %54, %58 : vector<8x8xf32>
    %cst_20 = arith.constant dense<0.000000e+00> : vector<8x8xf32>
    %60 = tpu.matmul %59, %48, %cst_20 {dimension_numbers = #tpu.dot_dimension_numbers<[1], [0], [0], [1], [0, 0, 1, 1], [], []>} : vector<8x8xf32>, vector<8x8xf32>, vector<8x8xf32> -> vector<8x8xf32>
    %61 = vector.extract_strided_slice %7 {offsets = [0, 24], sizes = [8, 8], strides = [1, 1]} : vector<8x32xf32> to vector<8x8xf32>
    %cst_21 = arith.constant 0.353553385 : f32
    %62 = vector.broadcast %cst_21 : f32 to vector<8x8xf32>
    %63 = arith.mulf %61, %62 : vector<8x8xf32>
    %64 = vector.extract_strided_slice %8 {offsets = [0, 24], sizes = [8, 8], strides = [1, 1]} : vector<8x32xf32> to vector<8x8xf32>
    %65 = vector.extract_strided_slice %9 {offsets = [0, 24], sizes = [8, 8], strides = [1, 1]} : vector<8x32xf32> to vector<8x8xf32>
    %cst_22 = arith.constant dense<0.000000e+00> : vector<8x8xf32>
    %66 = tpu.matmul %63, %64, %cst_22 {dimension_numbers = #tpu.dot_dimension_numbers<[1], [1], [0], [0], [0, 0, 1, 0], [], []>} : vector<8x8xf32>, vector<8x8xf32>, vector<8x8xf32> -> vector<8x8xf32>
    %cst_23 = arith.constant dense<0xFF800000> : vector<8xf32>
    %67 = vector.multi_reduction <maximumf>, %66, %cst_23 [1] : vector<8x8xf32> to vector<8xf32>
    %68 = vector.shape_cast %67 : vector<8xf32> to vector<8x1xf32>
    %69 = vector.broadcast %68 : vector<8x1xf32> to vector<8x8xf32>
    %70 = arith.subf %66, %69 : vector<8x8xf32>
    %71 = math.exp %70 : vector<8x8xf32>
    %cst_24 = arith.constant dense<0.000000e+00> : vector<8xf32>
    %72 = vector.multi_reduction <add>, %71, %cst_24 [1] : vector<8x8xf32> to vector<8xf32>
    %73 = vector.shape_cast %72 : vector<8xf32> to vector<8x1xf32>
    %74 = tpu.reciprocal %73 {approx = true} : vector<8x1xf32> -> vector<8x1xf32>
    %75 = vector.broadcast %74 : vector<8x1xf32> to vector<8x8xf32>
    %76 = arith.mulf %71, %75 : vector<8x8xf32>
    %cst_25 = arith.constant dense<0.000000e+00> : vector<8x8xf32>
    %77 = tpu.matmul %76, %65, %cst_25 {dimension_numbers = #tpu.dot_dimension_numbers<[1], [0], [0], [1], [0, 0, 1, 1], [], []>} : vector<8x8xf32>, vector<8x8xf32>, vector<8x8xf32> -> vector<8x8xf32>
    %78 = tpu.concatenate %26, %43, %60, %77 in 1 : vector<8x8xf32>, vector<8x8xf32>, vector<8x8xf32>, vector<8x8xf32> -> vector<8x32xf32>
    %c0_26 = arith.constant 0 : index
    %c0_27 = arith.constant 0 : index
    %79 = vector.load %arg4[%c0_26, %c0_27] : memref<32x32xf32, #tpu.memory_space<vmem>>, vector<32x32xf32>
    %cst_28 = arith.constant dense<0.000000e+00> : vector<8x32xf32>
    %80 = tpu.matmul %78, %79, %cst_28 {dimension_numbers = #tpu.dot_dimension_numbers<[1], [0], [0], [1], [0, 0, 1, 1], [], []>} : vector<8x32xf32>, vector<32x32xf32>, vector<8x32xf32> -> vector<8x32xf32>
    %c0_29 = arith.constant 0 : index
    %c0_30 = arith.constant 0 : index
    %81 = vector.load %arg5[%c0_29, %c0_30] : memref<1x32xf32, #tpu.memory_space<vmem>>, vector<1x32xf32>
    %82 = vector.broadcast %81 : vector<1x32xf32> to vector<8x32xf32>
    %83 = arith.addf %80, %82 : vector<8x32xf32>
    %c0_31 = arith.constant 0 : index
    %c0_32 = arith.constant 0 : index
    %c0_33 = arith.constant 0 : index
    %84 = vector.load %arg6[%c0_31, %c0_32, %c0_33] : memref<1x8x32xf32, #tpu.memory_space<vmem>>, vector<1x8x32xf32>
    %85 = vector.shape_cast %84 : vector<1x8x32xf32> to vector<8x32xf32>
    %86 = vector.shape_cast %83 : vector<8x32xf32> to vector<1x8x32xf32>
    tpu.vector_store %arg6[%c0_31, %c0_32, %c0_33], %86 {strides = array<i32>} : memref<1x8x32xf32, #tpu.memory_space<vmem>>, vector<1x8x32xf32>,
    return
  }
  func.func @transform_0(%arg0: i32) -> (i32, i32, i32) {
    %c0_i32 = arith.constant 0 : i32
    %c0_i32_0 = arith.constant 0 : i32
    %c0_i32_1 = arith.constant 0 : i32
    return %arg0, %c0_i32, %c0_i32_0 : i32, i32, i32
  }
  func.func @transform_1(%arg0: i32) -> (i32, i32) {
    %c0_i32 = arith.constant 0 : i32
    %c0_i32_0 = arith.constant 0 : i32
    %c0_i32_1 = arith.constant 0 : i32
    return %c0_i32, %c0_i32_0 : i32, i32
  }
  func.func @transform_2(%arg0: i32) -> (i32, i32) {
    %c0_i32 = arith.constant 0 : i32
    %c0_i32_0 = arith.constant 0 : i32
    %c0_i32_1 = arith.constant 0 : i32
    return %c0_i32, %c0_i32_0 : i32, i32
  }
  func.func @transform_3(%arg0: i32) -> (i32, i32) {
    %c0_i32 = arith.constant 0 : i32
    %c0_i32_0 = arith.constant 0 : i32
    %c0_i32_1 = arith.constant 0 : i32
    return %c0_i32, %c0_i32_0 : i32, i32
  }
  func.func @transform_4(%arg0: i32) -> (i32, i32) {
    %c0_i32 = arith.constant 0 : i32
    %c0_i32_0 = arith.constant 0 : i32
    %c0_i32_1 = arith.constant 0 : i32
    return %c0_i32, %c0_i32_0 : i32, i32
  }
  func.func @transform_5(%arg0: i32) -> (i32, i32, i32) {
    %c0_i32 = arith.constant 0 : i32
    %c0_i32_0 = arith.constant 0 : i32
    %c0_i32_1 = arith.constant 0 : i32
    return %arg0, %c0_i32, %c0_i32_0 : i32, i32, i32
  }
}

</mosaic_0001>

<bundles_post_ra>
// kernel: tpu_custom_call.1
= control target key start
LH: loop header
LB: loop body
LE: loop exit
PB: predicated region body
PF: predicated region fallthrough
CT: control target
= control target key end

     0   :  { %10 = vsyncpa [#allocation3], 0  ;;  %s1976_s0 = inlined_call_operand.hbm [shape: f32[2,8,32], index: 0, kind: input, shape index: {}]   ;;  %s1977_s1 = inlined_call_operand.hbm [shape: f32[32,96], index: 1, kind: input, shape index: {}]   ;;  %s1978_s2 = inlined_call_operand.vmem [shape: f32[1,96], index: 2, kind: input, shape index: {}]   ;;  %s1979_s3 = inlined_call_operand.hbm [shape: f32[32,32], index: 3, kind: input, shape index: {}]   ;;  %s1980_s4 = inlined_call_operand.vmem [shape: f32[1,32], index: 4, kind: input, shape index: {}]   ;;  %s1981_s5 = inlined_call_operand.hbm [shape: f32[2,8,32], index: 5, kind: output, shape index: {}]  }
   0x1   :  { %12 = vsyncpa [#allocation3 + $0x1], 0 }
   0x2   :  { %13 = vsyncpa [#allocation6], 0 }
   0x3   :  { %14 = vsyncpa [#allocation4], 0 }
   0x4   :  { %16 = vsyncpa [#allocation4 + $0x1], 0  ;;  %s1667_s18 = smov 0   ;;  %s1669_s19 = smov 0  }
   0x5   :  { %s1671_s20 = smov 0   ;;  %s1673_s21 = smov 0  }
   0x6 LB: > { %s1688_s22 = sadd.s32 4294967295, %s1612_s21   ;;  %s1222_s23 = sadd.s32 4294967294, %s1612_s21   ;;  %s1612_s21 = sphi %s1673_s21, %s2001_s21   ;;  %s1608_s20 = sphi %s1671_s20, %s2000_s20   ;;  %s1604_s19 = sphi %s1669_s19, %s1999_s19   ;;  %s1600_s18 = sphi %s1667_s18, %s1998_s18  }
   0x7   : > { %p42_p0 = scmp.ne.s32.totalorder %s1604_s19, %s1600_s18  ;;  %p1982_p1 = scmp.eq.s32.totalorder %s1688_s22, 0 }
   0x8   : > { %p156_p3 = scmp.eq.s32.totalorder %s1222_s23, 1  ;;  %p1223_p5 = scmp.ge.s32.totalorder %s1612_s21, 1 }
   0x9   : > { %p1697_p4 = por %p1982_p1, %p42_p0  ;;  %p163_p7 = scmp.lt.s32.totalorder %s1612_s21, 3 }
   0xa   : > { %p1702_p6 = por %p156_p3, %p42_p0  ;;  %s1614_s27 = smov [#allocation5]  }
   0xb   : > { %s1985_s24 = scalar_select %p1697_p4, 1, 0 }
   0xc   : > { %s1986_s25 = scalar_select %p1702_p6, 1, 0 }
   0xd   : > { %p1707_p8 = pnand %p1223_p5, %p163_p7  ;;  %s175_s28 = sshll.u32 %s1614_s27, 4  ;;  %s1711_s28 = int_to_ptr.vmem [resolvable:$true] %s175_s28 }
   0xe   : > { %s1615_s30 = smov [#allocation7]   ;;  %s1456_s9 = scalar_lea.hbm %s1977_s1, 512 }
   0xf   : > { %p1366_p9 = pneg %p1707_p8  ;;  %s191_s6 = sshll.u32 %s1615_s30, 4  ;;  %s1722_s6 = int_to_ptr.vmem [resolvable:$true] %s191_s6 }
  0x10   : > { %p1457_p12 = scmp.ne.s32.totalorder %s1977_s1, %s1456_s9  ;;  %p1463_p5 = scmp.lt.u32.totalorder %s1456_s9, %s1977_s1 }
  0x11   : > { %p1718_p11 = pnand %p1366_p9, %p1982_p1 }
  0x13   : > { %p1458_p13 = pneg %p1718_p11 }
  0x15   : > { %p1459_p0 = pnand %p1458_p13, %p1457_p12 }
  0x17   : > { %p1460_p3 = pneg %p1459_p0 }
  0x19   : > { %p1465_p7 = pnand %p1463_p5, %p1460_p3 }
  0x1b   : > { %1468 = shalt.err (!%p1465_p7)
}
  0x1c   : > { %s1469_s14 = scalar_lea.vmem %s1711_s28, 512  ;;  %p1477_p2 = scmp.lt.s32.totalorder %s1711_s28, %s1711_s28 }
  0x1d   : > { %p1470_p9 = scmp.ne.s32.totalorder %s1711_s28, %s1469_s14  ;;  %p1478_p12 = scmp.lt.s32.totalorder %s1469_s14, %s1469_s14 }
  0x1f   : > { %p1472_p10 = pnand %p1470_p9, %p1458_p13  ;;  %p1479_p0 = por %p1478_p12, %p1477_p2 }
  0x21   : > { %p1473_p1 = pneg %p1472_p10 }
  0x23   : > { %p1480_p6 = pnand %p1479_p0, %p1473_p1 }
  0x25   : > { %1483 = shalt.err (!%p1480_p6)
}
  0x26   : > { %s1616_s15 = smov 128   ;;  %s1617_s16 = smov 8  }
  0x27   : > { %1369 = dma.hbm_to_vmem [thread:$0]  (!%p1718_p11), %s1977_s1, 512, %s1711_s28, [#allocation6], %s1616_s15, %s1616_s15, %s1617_s16  }
  0x28   : > { %s1484_s7 = scalar_lea.hbm %s1979_s3, 512 }
  0x29   : > { %p1485_p2 = scmp.ne.s32.totalorder %s1979_s3, %s1484_s7  ;;  %p1491_p10 = scmp.lt.u32.totalorder %s1484_s7, %s1979_s3 }
  0x2b   : > { %p1487_p1 = pnand %p1485_p2, %p1458_p13 }
  0x2d   : > { %p1488_p6 = pneg %p1487_p1 }
  0x2f   : > { %p1493_p3 = pnand %p1491_p10, %p1488_p6 }
  0x31   : > { %1496 = shalt.err (!%p1493_p3)
}
  0x32   : > { %s1497_s28 = scalar_lea.vmem %s1722_s6, 512  ;;  %p1505_p12 = scmp.lt.s32.totalorder %s1722_s6, %s1722_s6 }
  0x33   : > { %p1498_p5 = scmp.ne.s32.totalorder %s1722_s6, %s1497_s28  ;;  %p1506_p0 = scmp.lt.s32.totalorder %s1497_s28, %s1497_s28 }
  0x35   : > { %p1500_p7 = pnand %p1498_p5, %p1458_p13  ;;  %p1507_p2 = por %p1506_p0, %p1505_p12 }
  0x37   : > { %p1501_p9 = pneg %p1500_p7 }
  0x39   : > { %p1508_p1 = pnand %p1507_p2, %p1501_p9 }
  0x3b   : > { %1511 = shalt.err (!%p1508_p1)
}
  0x3c   : > { %1372 = dma.hbm_to_vmem [thread:$0]  (!%p1718_p11), %s1979_s3, 512, %s1722_s6, [#allocation6], %s1616_s15, %s1616_s15, %s1617_s16  }
  0x3d   : > { %s1777_s14 = sadd.s32 1, %s1612_s21   ;;  %s29_s29 = sadd.s32 1, %s1608_s20 }
  0x3e   : > { %s26_s17 = ssub.s32 %s1612_s21, %s1777_s14  ;;  %p36_p13 = scmp.ne.s32.totalorder %s1608_s20, %s1604_s19 }
  0x3f   : > { %p27_p6 = scmp.eq.s32.totalorder %s26_s17, 0  ;;  %p37_p10 = scmp.eq.s32.totalorder %s1612_s21, 0 }
  0x40   : > { %p1989_p3 = scmp.eq.s32.totalorder %s1688_s22, 1  ;;  %p1383_p7 = scmp.lt.s32.totalorder %s1612_s21, 2 }
  0x41   : > { %s1793_s27 = scalar_select %p27_p6, %s1608_s20, %s29_s29  }
  0x42   : > { %p1787_p5 = por %p1989_p3, %p36_p13  ;;  %p38_p9 = por %p37_p10, %p36_p13 }
  0x43   : > { %s208_s30 = sand.u32 1, %s1608_s20   ;;  %s1228_s6 = sshll.u32 %s1612_s21, 7 }
  0x44   : > { %s1990_s23 = scalar_select %p1787_p5, 1, 0 }
  0x45   : > { %s1227_s7 = sshll.u32 %s208_s30, 3  ;;  %s1800_s8 = scalar_lea.hbm %s1976_s0, %s1228_s6 }
  0x46   : > { %s212_s9 = scalar_lea.vmem [#allocation2], %s1227_s7  ;;  %p1804_p11 = pnand %p1383_p7, %p38_p9 }
  0x47   : > { %s219_s10 = sshll.u32 %s212_s9, 4  ;;  %s209_s28 = scalar_lea.sflag [#allocation3], %s208_s30  ;;  %s1802_s10 = int_to_ptr.vmem [resolvable:$true] %s219_s10 }
  0x48   : > { %s1512_s12 = scalar_lea.hbm %s1800_s8, 128  ;;  %p1514_p0 = pneg %p1804_p11 }
  0x49   : > { %p1513_p12 = scmp.ne.s32.totalorder %s1800_s8, %s1512_s12  ;;  %s1517_s17 = scalar_lea.hbm %s1976_s0, 256 }
  0x4a   : > { %p1518_p13 = scmp.lt.u32.totalorder %s1800_s8, %s1976_s0  ;;  %p1519_p6 = scmp.lt.u32.totalorder %s1517_s17, %s1512_s12 }
  0x4b   : > { %p1515_p2 = pnand %p1514_p0, %p1513_p12  ;;  %p1521_p3 = scmp.lt.u32.totalorder %s1512_s12, %s1800_s8 }
  0x4c   : > { %p1520_p10 = por %p1519_p6, %p1518_p13 }
  0x4d   : > { %p1516_p1 = pneg %p1515_p2 }
  0x4e   : > { %p1522_p7 = por %p1521_p3, %p1520_p10 }
  0x50   : > { %p1523_p9 = pnand %p1522_p7, %p1516_p1 }
  0x52   : > { %1526 = shalt.err (!%p1523_p9)
}
  0x53   : > { %s1527_s30 = scalar_lea.vmem %s1802_s10, 128  ;;  %s1618_s15 = smov [#allocation2]  }
  0x54   : > { %p1528_p12 = scmp.ne.s32.totalorder %s1802_s10, %s1527_s30  ;;  %s1532_s16 = sshll.u32 %s1618_s15, 4  ;;  %s1533_s16 = int_to_ptr.vmem [resolvable:$false] %s1532_s16 }
  0x55   : > { %s1534_s9 = scalar_lea.vmem %s1533_s16, 256  ;;  %p1535_p4 = scmp.lt.s32.totalorder %s1802_s10, %s1533_s16 }
  0x56   : > { %p1530_p2 = pnand %p1528_p12, %p1514_p0  ;;  %p1536_p13 = scmp.lt.s32.totalorder %s1534_s9, %s1527_s30 }
  0x58   : > { %p1531_p5 = pneg %p1530_p2  ;;  %p1537_p6 = por %p1536_p13, %p1535_p4 }
  0x5a   : > { %p1538_p10 = pnand %p1537_p6, %p1531_p5 }
  0x5c   : > { %1541 = shalt.err (!%p1538_p10)
}
  0x5d   : > { %1376 = dma.hbm_to_vmem [thread:$0]  (!%p1804_p11), %s1800_s8, 128, %s1802_s10, %s209_s28  }
  0x5e   : > { %228 = sbr.rel (%p1707_p8) target bundleno = 2107 (0x83b), region = 40  ;;  %s1836_s12 = sand.u32 (!%p1707_p8), 1, %s1604_s19  }
  0x5f   : > { %s1230_s13 = sshll.u32 (!%p1707_p8), %s1836_s12, 3  ;;  %s231_s29 = scalar_lea.sflag (!%p1707_p8), [#allocation3], %s1836_s12 }
  0x60   : > { %s234_s17 = scalar_lea.vmem (!%p1707_p8), [#allocation2], %s1230_s13  ;;  %p1992_p4 = scmp.ne.s32.totalorder (!%p1707_p8), %s1985_s24, 0 }
  0x65   : > { %1587 = dma.done.wait (%p1992_p4), %s231_s29, 128  }
  0x66   : > { %1589 = vsyncadd (%p1992_p4), %s231_s29, 4294967168  ;;  %p1993_p5 = scmp.eq.s32.totalorder %s1688_s22, 0 }
  0x68   : > { %1591 = dma.done.wait (%p1993_p5), [#allocation6], 1024   ;;  %p1994_p8 = pmov %p1993_p5 }
  0x69   : > { %v1619_v0 = vmov 0.0|0.0   ;;  %vm1620_vm0 = vmmov 0   ;;  %v1621_v1 = vmov 0.0   ;;  %v270_v2 = vld [vmem:[#allocation5] sm:$0xff]  ;;  %v271_v3 = vld [vmem:[#allocation5 + $0x8] sm:$0xff]  ;;  %v272_v4 = vld [vmem:[#allocation5 + $0x10] sm:$0xff] }
  0x6a   : > { %1593 = vsyncadd (%p1994_p8), [#allocation6], 4294966272  ;;  %1342 = vmatprep.subr.bf16.mxu0 %v1619_v0  ;;  %1288 = vmatprep.mubr.msk.f32.mxu0 %vm1620_vm0, %v1621_v1  ;;  %v1343_v5 = vpack.c.bf16 %v271_v3, %v270_v2  ;;  %v273_v6 = vld [vmem:[#allocation5 + $0x18] sm:$0xff]  ;;  %vm281_vm1 = vcmask 261120   ;;  %v1234_v9 = vld [vmem:[%s1978_s2] ss:$0 sm:$0xff] }
  0x6b   : > { %1291 = vmatprep.subr.mxu1 %v1621_v1  ;;  %1293 = vmatprep.mubr.msk.f32.mxu1 %vm1620_vm0, %v1621_v1  ;;  %v1346_v7 = vpack.c.bf16 %v273_v6, %v272_v4  ;;  %v269_v8 = vld [vmem:[%s234_s17] sm:$0xff]  ;;  %s1622_s8 = smov 64   ;;  %s1623_s10 = smov 96   ;;  %vm359_vm2 = vcmask 64512   ;;  %vm1030_vm3 = vcmask 130048   ;;  %vm1032_vm4 = vcmask 195584  }
  0x6c   : > { %1344 = vmatpush3.bf16.msra.mxu0 %v1343_v5  ;;  %s1624_s11 = smov 88   ;;  %s1625_s28 = smov 120  }
  0x6d   : > { %1345 = vmatprep.subr.bf16.mxu0 %v1619_v0  ;;  %s1626_s7 = smov 80   ;;  %s1627_s6 = smov 72  }
  0x6e   : > { %s1628_s30 = smov 112   ;;  %s1629_s15 = smov 104  }
  0x6f   : > { %s1630_s16 = smov 56   ;;  %s1631_s9 = smov 48  }
  0x70   : > { %1347 = vmatpush3.bf16.msra.mxu0 %v1346_v7  ;;  %s1632_s29 = smov 40   ;;  %s1633_s17 = smov 8  }
  0x71   : > { %1311 = vmatprep.subr.mxu0 %v1621_v1  ;;  %s1634_s24 = smov 16   ;;  %s1635_s26 = smov 24  }
  0x72   : > { %p1995_p0 = scmp.ne.s32.totalorder %s1990_s23, 0 }
  0x73   : > { %1289 = vmatmul.mubr.msk.f32.vlgmr.msra.gmra.mrb[0].mxu0 %vm281_vm1, %v269_v8 }
  0x74   : > { %1313 = vmatprep.mubr.msk.f32.mxu0 %vm1620_vm0, %v1621_v1 }
 0x146   : > { %v351_v10 = vpop.f32.mrb[0].mxu0 }
 0x147   : > { %v1864_v11 = vadd.f32 %v1234_v9, %v351_v10  ;;  %v1290_v12 = vpop.f32.mrb[1].mxu0  ;;  %v1034_v9 = vld [vmem:[#allocation7] sm:$0xff]  ;;  %v1035_v10 = vld [vmem:[#allocation7 + $0x8] sm:$0xff] }
 0x148   : > { %v1036_v12 = vld [vmem:[#allocation7 + $0x10] sm:$0xff] }
 0x149   : > { %446 = vrot.lane.b32.xlu1 %v1864_v11, %s1622_s8  ;;  %357 = vrot.lane.b32.xlu0 %v1864_v11, %s1623_s10  ;;  %v355_v13 = vmul.f32 0.35355338, %v1864_v11 }
 0x14d   : > { %524 = vrot.lane.b32.xlu1 %v1864_v11, %s1624_s11  ;;  %s1251_s11 = sshll.u32 %s1688_s22, 7 }
 0x151   : > { %522 = vrot.lane.b32.xlu1 %v355_v13, %s1625_s28  ;;  %s268_s28 = scalar_lea.vmem [#allocation8], %s1230_s13  ;;  %s1636_s13 = smov [#allocation8]  }
 0x155   : > { %689 = vrot.lane.b32.xlu1 %v1864_v11, %s1626_s7  ;;  %s1133_s7 = sshll.u32 %s268_s28, 4  ;;  %s1933_s7 = int_to_ptr.vmem [resolvable:$true] %s1133_s7 }
 0x156   : > { %s1542_s22 = scalar_lea.vmem %s1933_s7, 128 }
 0x157   : > { %p1543_p11 = scmp.ne.s32.totalorder %s1933_s7, %s1542_s22 }
 0x159   : > { %p1544_p1 = pnand %p1543_p11, %p1995_p0 }
 0x15b   : > { %p1545_p3 = pneg %p1544_p1 }
 0x1bb   : > { %v447_v14 = vpop.permute.xlu1 %446  ;;  %v358_v15 = vpop.permute.xlu0 %357 }
 0x1bc   : > { %1292 = vmatpush3.xpose.msk.msra.mxu1 %vm359_vm2, %v358_v15 }
 0x1bd   : > { %1296 = vmatprep.subr.mxu1 %v1621_v1 }
 0x1bf   : > { %v525_v16 = vpop.permute.xlu1 %524  ;;  %1294 = vmatmul.mubr.msk.f32.vlgmr.msra.gmra.mrb[0].mxu1 %vm359_vm2, %v355_v13 }
 0x1c0   : > { %1297 = vmatpush3.msra.mxu1 %v447_v14  ;;  %1298 = vmatprep.mubr.msk.f32.mxu1 %vm1620_vm0, %v1621_v1 }
 0x1c1   : > { %1301 = vmatprep.subr.mxu1 %v1621_v1 }
 0x1c3   : > { %v523_v17 = vpop.permute.xlu1 %522 }
 0x1c7   : > { %v690_v18 = vpop.permute.xlu1 %689 }
 0x1c8   : > { %1312 = vmatpush3.xpose.msk.msra.mxu0 %vm359_vm2, %v690_v18 }
 0x1c9   : > { %1321 = vmatprep.subr.mxu0 %v1621_v1 }
 0x292   : > { %v431_v19 = vpop.f32.mrb[0].mxu1 }
 0x293   : > { %v1295_v20 = vpop.f32.mrb[1].mxu1  ;;  %v435_v21 = vsel %vm359_vm2, %v431_v19, -inf }
 0x294   : > { %436 = vmax.xlane.f32.xlu0 %v435_v21 }
 0x2aa   : > { %854 = vrot.lane.b32.xlu0 %v1864_v11, %s1627_s6 }
 0x321   : > { %v437_v22 = vpop.xlane.xlu0 %436 }
 0x322   : > { %v438_v23 = vsub.f32 %v431_v19, %v437_v22 }
 0x324   : > { %v439_v24 = vmul.f32 1.442695, %v438_v23 }
 0x325   : > { %v855_v29 = vpop.permute.xlu0 %854 }
 0x326   : > { %1440 = vpow2.f32 %v439_v24 }
 0x330   : > { %v1441_v25 = vpop.eup %1440 }
 0x331   : > { %v441_v26 = vsel %vm359_vm2, %v1441_v25, 0.0 }
 0x332   : > { %442 = vadd.xlane.f32.xlu1 %v441_v26 }
 0x343   : > { %687 = vrot.lane.b32.xlu1 %v355_v13, %s1628_s30 }
 0x347   : > { %852 = vrot.lane.b32.xlu1 %v355_v13, %s1629_s15  ;;  %v1037_v13 = vld [vmem:[#allocation7 + $0x18] sm:$0xff]  ;;  %s1931_s15 = scalar_lea.hbm %s1981_s5, %s1251_s11 }
 0x348   : > { %v1352_v14 = vpack.c.bf16 %v1037_v13, %v1036_v12 }
 0x3bf   : > { %v443_v27 = vpop.xlane.xlu1 %442 }
 0x3c0   : > { %1442 = vrcp.f32 %v443_v27 }
 0x3c3   : > { %v688_v28 = vpop.permute.xlu1 %687 }
 0x3c4   : > { %1314 = vmatmul.mubr.msk.f32.vlgmr.msra.gmra.mrb[2].mxu0 %vm359_vm2, %v688_v28 }
 0x3c5   : > { %1322 = vmatpush3.xpose.msk.msra.mxu0 %vm359_vm2, %v855_v29  ;;  %1323 = vmatprep.mubr.msk.f32.mxu0 %vm1620_vm0, %v1621_v1 }
 0x3c6   : > { %1348 = vmatprep.subr.bf16.mxu0 %v1619_v0 }
 0x3c7   : > { %v853_v30 = vpop.permute.xlu1 %852 }
 0x3c8   : > { %1324 = vmatmul.mubr.msk.f32.vlgmr.msra.gmra.mrb[4].mxu0 %vm359_vm2, %v853_v30 }
 0x3c9   : > { %1339 = vmatprep.mubr.msk.f32.mxu0 %vm1620_vm0, %v1621_v1 }
 0x3ca   : > { %v1443_v31 = vpop.eup %1442 }
 0x3cb   : > { %v445_v32 = vmul.f32 %v1443_v31, %v1441_v25  ;;  %v1248_v25 = vld [vmem:[%s1980_s4] ss:$0 sm:$0xff] }
 0x3cd   : > { %1299 = vmatmul.mubr.msk.f32.vlgmr.msra.gmra.mrb[2].mxu1 %vm359_vm2, %v445_v32 }
 0x3ce   : > { %1302 = vmatpush3.xpose.msk.msra.mxu1 %vm359_vm2, %v525_v16  ;;  %1303 = vmatprep.mubr.msk.f32.mxu1 %vm1620_vm0, %v1621_v1 }
 0x3cf   : > { %1306 = vmatprep.subr.mxu1 %v1621_v1 }
 0x3d1   : > { %1304 = vmatmul.mubr.msk.f32.vlgmr.msra.gmra.mrb[4].mxu1 %vm359_vm2, %v523_v17 }
 0x3d2   : > { %1308 = vmatprep.mubr.msk.f32.mxu1 %vm1620_vm0, %v1621_v1 }
 0x497   : > { %v761_v33 = vpop.f32.mrb[2].mxu0 }
 0x498   : > { %v1315_v34 = vpop.f32.mrb[3].mxu0  ;;  %v765_v35 = vsel %vm359_vm2, %v761_v33, -inf }
 0x499   : > { %766 = vmax.xlane.f32.xlu0 %v765_v35 }
 0x49b   : > { %v926_v36 = vpop.f32.mrb[4].mxu0 }
 0x49c   : > { %v1325_v37 = vpop.f32.mrb[5].mxu0  ;;  %v930_v43 = vsel %vm359_vm2, %v926_v36, -inf }
 0x4a0   : > { %v1899_v38 = vpop.f32.mrb[2].mxu1 }
 0x4a1   : > { %v1300_v39 = vpop.f32.mrb[3].mxu1 }
 0x4a4   : > { %v596_v40 = vpop.f32.mrb[4].mxu1 }
 0x4a5   : > { %v1305_v41 = vpop.f32.mrb[5].mxu1  ;;  %v600_v42 = vsel %vm359_vm2, %v596_v40, -inf }
 0x4a6   : > { %601 = vmax.xlane.f32.xlu1 %v600_v42 }
 0x4aa   : > { %931 = vmax.xlane.f32.xlu1 %v930_v43 }
 0x526   : > { %v767_v44 = vpop.xlane.xlu0 %766 }
 0x527   : > { %v768_v45 = vsub.f32 %v761_v33, %v767_v44 }
 0x529   : > { %v769_v46 = vmul.f32 1.442695, %v768_v45 }
 0x52b   : > { %1444 = vpow2.f32 %v769_v46 }
 0x533   : > { %v602_v47 = vpop.xlane.xlu1 %601 }
 0x534   : > { %v603_v55 = vsub.f32 %v596_v40, %v602_v47 }
 0x535   : > { %v1445_v48 = vpop.eup %1444 }
 0x536   : > { %v771_v49 = vsel %vm359_vm2, %v1445_v48, 0.0  ;;  %v604_v56 = vmul.f32 1.442695, %v603_v55 }
 0x537   : > { %772 = vadd.xlane.f32.xlu1 %v771_v49  ;;  %v932_v50 = vpop.xlane.xlu1 %931 }
 0x538   : > { %v933_v51 = vsub.f32 %v926_v36, %v932_v50 }
 0x53a   : > { %v934_v52 = vmul.f32 1.442695, %v933_v51 }
 0x53c   : > { %1446 = vpow2.f32 %v934_v52 }
 0x53d   : > { %1448 = vpow2.f32 %v604_v56 }
 0x546   : > { %v1447_v53 = vpop.eup %1446 }
 0x547   : > { %v936_v54 = vsel %vm359_vm2, %v1447_v53, 0.0  ;;  %v1449_v57 = vpop.eup %1448 }
 0x548   : > { %611 = vrot.lane.b32.xlu1 %v1864_v11, %s1630_s16  ;;  %937 = vadd.xlane.f32.xlu0 %v936_v54  ;;  %v606_v58 = vsel %vm359_vm2, %v1449_v57, 0.0  ;;  %s1120_s16 = scalar_lea.sflag [#allocation4], %s1836_s12 }
 0x55e   : > { %776 = vrot.lane.b32.xlu0 %v1864_v11, %s1631_s9  ;;  %s1546_s9 = sshll.u32 %s1636_s13, 4  ;;  %s1547_s9 = int_to_ptr.vmem [resolvable:$false] %s1546_s9 }
 0x55f   : > { %p1549_p7 = scmp.lt.s32.totalorder %s1933_s7, %s1547_s9 }
 0x56c   : > { %607 = vadd.xlane.f32.xlu1 %v606_v58 }
 0x57d   : > { %941 = vrot.lane.b32.xlu1 %v1864_v11, %s1632_s29  ;;  %v1349_v11 = vpack.c.bf16 %v1035_v10, %v1034_v9  ;;  %s1548_s29 = scalar_lea.vmem %s1547_s9, 256 }
 0x57e   : > { %p1550_p9 = scmp.lt.s32.totalorder %s1548_s29, %s1542_s22 }
 0x57f   : > { %1350 = vmatpush3.bf16.msra.mxu0 %v1349_v11 }
 0x580   : > { %1351 = vmatprep.subr.bf16.mxu0 %v1619_v0  ;;  %p1551_p12 = por %p1550_p9, %p1549_p7 }
 0x582   : > { %p1552_p2 = pnand %p1551_p12, %p1545_p3 }
 0x583   : > { %1353 = vmatpush3.bf16.msra.mxu0 %v1352_v14 }
 0x5c4   : > { %v773_v59 = vpop.xlane.xlu1 %772 }
 0x5c8   : > { %v612_v60 = vpop.permute.xlu1 %611 }
 0x5c9   : > { %1307 = vmatpush3.msra.mxu1 %v612_v60 }
 0x5ca   : > { %1316 = vmatprep.subr.mxu1 %v1621_v1 }
 0x5d5   : > { %v938_v62 = vpop.xlane.xlu0 %937 }
 0x5d9   : > { %v777_v4 = vpop.permute.xlu0 %776 }
 0x5f9   : > { %v608_v61 = vpop.xlane.xlu1 %607 }
 0x5fa   : > { %1450 = vrcp.f32 %v608_v61 }
 0x5fb   : > { %1452 = vrcp.f32 %v773_v59 }
 0x5fc   : > { %1454 = vrcp.f32 %v938_v62 }
 0x5fd   : > { %v942_v7 = vpop.permute.xlu1 %941 }
 0x604   : > { %v1451_v63 = vpop.eup %1450 }
 0x605   : > { %v610_v2 = vmul.f32 %v1451_v63, %v1449_v57  ;;  %v1453_v3 = vpop.eup %1452 }
 0x606   : > { %v775_v5 = vmul.f32 %v1453_v3, %v1445_v48  ;;  %v1455_v6 = vpop.eup %1454 }
 0x607   : > { %1309 = vmatmul.mubr.msk.f32.vlgmr.msra.gmra.mrb[6].mxu1 %vm359_vm2, %v610_v2  ;;  %v940_v8 = vmul.f32 %v1455_v6, %v1447_v53 }
 0x608   : > { %1317 = vmatpush3.msra.mxu1 %v777_v4  ;;  %1318 = vmatprep.mubr.msk.f32.mxu1 %vm1620_vm0, %v1621_v1 }
 0x609   : > { %1326 = vmatprep.subr.mxu1 %v1621_v1 }
 0x60b   : > { %1319 = vmatmul.mubr.msk.f32.vlgmr.msra.gmra.mrb[8].mxu1 %vm359_vm2, %v775_v5 }
 0x60c   : > { %1327 = vmatpush3.msra.mxu1 %v942_v7  ;;  %1328 = vmatprep.mubr.msk.f32.mxu1 %vm1620_vm0, %v1621_v1 }
 0x60f   : > { %1329 = vmatmul.mubr.msk.f32.vlgmr.msra.gmra.mrb[10].mxu1 %vm359_vm2, %v940_v8 }
 0x6da   : > { %v683_v15 = vpop.f32.mrb[6].mxu1 }
 0x6db   : > { %1018 = vrot.lane.b32.xlu1 %v683_v15, %s1633_s17  ;;  %v1310_v16 = vpop.f32.mrb[7].mxu1 }
 0x6de   : > { %v848_v17 = vpop.f32.mrb[8].mxu1 }
 0x6df   : > { %1022 = vrot.lane.b32.xlu0 %v848_v17, %s1634_s24  ;;  %v1320_v1 = vpop.f32.mrb[9].mxu1 }
 0x6e2   : > { %v1013_v18 = vpop.f32.mrb[10].mxu1 }
 0x6e3   : > { %1026 = vrot.lane.b32.xlu1 %v1013_v18, %s1635_s26  ;;  %v1330_v19 = vpop.f32.mrb[11].mxu1 }
 0x74d   : > { %v1019_v20 = vpop.permute.xlu1 %1018 }
 0x74e   : > { %v1029_v21 = vsel %vm359_vm2, %v1899_v38, %v1019_v20 }
 0x751   : > { %v1023_v0 = vpop.permute.xlu0 %1022 }
 0x752   : > { %v1031_v22 = vsel %vm1030_vm3, %v1029_v21, %v1023_v0 }
 0x755   : > { %v1027_v23 = vpop.permute.xlu1 %1026 }
 0x756   : > { %v1033_v24 = vsel %vm1032_vm4, %v1031_v22, %v1027_v23 }
 0x757   : > { %1340 = vmatmul.mubr.msk.f32.vlgmr.msra.gmra.mrb[6].mxu0 %vm281_vm1, %v1033_v24 }
 0x82a   : > { %v1114_v26 = vpop.f32.mrb[6].mxu0 }
 0x82b   : > { %v1115_v27 = vadd.f32 %v1248_v25, %v1114_v26  ;;  %v1341_v28 = vpop.f32.mrb[7].mxu0 }
 0x82d   : > { %1118 = vst.msk [vmem:[%s268_s28] sm:$0xff] %vm281_vm1, %v1115_v27 }
 0x82e   : > { %1555 = shalt.err (!%p1552_p2)
}
 0x82f   : > { %s1556_s12 = scalar_lea.hbm %s1931_s15, 128  ;;  %s1560_s26 = scalar_lea.hbm %s1981_s5, 256 }
 0x830   : > { %p1557_p13 = scmp.ne.s32.totalorder %s1931_s15, %s1556_s12  ;;  %p1561_p4 = scmp.lt.u32.totalorder %s1931_s15, %s1981_s5 }
 0x831   : > { %p1562_p5 = scmp.lt.u32.totalorder %s1560_s26, %s1556_s12  ;;  %p1564_p11 = scmp.lt.u32.totalorder %s1556_s12, %s1931_s15 }
 0x832   : > { %p1558_p6 = pnand %p1557_p13, %p1995_p0 }
 0x833   : > { %p1563_p8 = por %p1562_p5, %p1561_p4 }
 0x834   : > { %p1559_p10 = pneg %p1558_p6 }
 0x835   : > { %p1565_p1 = por %p1564_p11, %p1563_p8 }
 0x837   : > { %p1566_p3 = pnand %p1565_p1, %p1559_p10 }
 0x839   : > { %1569 = shalt.err (!%p1566_p3)
}
 0x83a   : > { %1364 = dma.vmem_to_hbm [thread:$0]  (%p1995_p0), %s1933_s7, 128, %s1931_s15, %s1120_s16  }
 0x83b PF: > { %s1145_s11 = sand.u32 1, %s1600_s18   ;;  %p1996_p7 = scmp.ne.s32.totalorder %s1986_s25, 0 }
 0x83c   : > { %p1997_p9 = scmp.ge.s32.totalorder %s1612_s21, 2  ;;  %s1146_s28 = scalar_lea.sflag [#allocation4], %s1145_s11 }
 0x83e   : > { %p1378_p12 = pnand %p1997_p9, %p1996_p7 }
 0x840   : > { %1595 = dma.done.wait (!%p1378_p12), %s1146_s28, 128  }
 0x841   : > { %1597 = vsyncadd (!%p1378_p12), %s1146_s28, 4294967168  ;;  %p19_p2 = scmp.ge.s32.totalorder %s1777_s14, 4   ;;  %s1998_s18 = smov %s1604_s19 }
 0x842   : > { %s1999_s19 = smov %s1608_s20  ;;  %s2000_s20 = smov %s1793_s27 }
 0x843   : > { %s2001_s21 = smov %s1777_s14  ;;  %21 = sbr.rel (!%p19_p2) target bundleno = 6 (0x6), region = 93 }
 0x84a   :  { %1151 = vsyncpa [#allocation3], 1 }
 0x84b   :  { %1153 = vsyncpa [#allocation3 + $0x1], 1 }
 0x84c   :  { %1154 = vsyncpa [#allocation6], 1 }
 0x84d   :  { %1155 = vsyncpa [#allocation4], 1 }
 0x84e   :  { %1157 = vsyncpa [#allocation4 + $0x1], 1 }

</bundles_post_ra>
